<compile_context>
chip_gen: v5e
topology: v5e:2x2
jax: 0.10.0
libtpu: 0.0.40
codegen_flags: <defaults>
</compile_context>

<pallas_src>
import math
from functools import partial

import jax
import jax.numpy as jnp
from jax.experimental import pallas as pl
from jax.experimental.pallas import tpu as pltpu

LANE = 128
SUBLANE = 8
_LOG2 = math.log(2.0)


def _logcosh_kernel(yt_ref, yp_ref, o_ref, acc_ref, *,
                    block_rows, blocks_per_core, total_elems, needs_mask):
    i = pl.program_id(1)

    @pl.when(i == 0)
    def _():
        acc_ref[...] = jnp.zeros_like(acc_ref)

    # Single cast inside the kernel (no-op for f32 inputs).
    d = yp_ref[...].astype(jnp.float32) - yt_ref[...].astype(jnp.float32)
    a = jnp.abs(d)
    # Numerically stable log(cosh(x)) = |x| + log1p(exp(-2|x|)) - log(2).
    lc = a + jnp.log1p(jnp.exp(-2.0 * a)) - jnp.float32(_LOG2)

    if needs_mask:
        c = pl.program_id(0)
        blk = c * blocks_per_core + i
        base = blk * (block_rows * LANE)
        row_ids = jax.lax.broadcasted_iota(jnp.int32, (block_rows, LANE), 0)
        lane_ids = jax.lax.broadcasted_iota(jnp.int32, (block_rows, LANE), 1)
        gidx = base + row_ids * LANE + lane_ids
        lc = jnp.where(gidx < total_elems, lc, jnp.float32(0.0))

    # Fold (block_rows, 128) into the fixed (8, 128) accumulator: leading-axis
    # sum = plain vreg adds on the VPU (no cross-lane XLU work per step).
    acc_ref[...] += jnp.sum(
        lc.reshape(block_rows // SUBLANE, SUBLANE, LANE), axis=0)

    @pl.when(i == blocks_per_core - 1)
    def _():
        # One cross-sublane reduce per core row; lane-dense (1, 128) store.
        o_ref[...] = jnp.sum(acc_ref[...], axis=0, keepdims=True)


def logcosh_loss(y_true, y_pred, *, max_block_rows=2048):
    assert y_true.shape == y_pred.shape, "y_true / y_pred must match"
    total = int(y_true.size)
    assert total > 0, "empty input"

    itemsize = jnp.dtype(y_true.dtype).itemsize
    # Row alignment for the (sublane, 128) tile of the input dtype
    # (8 for f32, 16 for bf16, 32 for int8/fp8).
    row_align = SUBLANE * max(1, 4 // itemsize)

    rows_needed = pl.cdiv(total, LANE)
    rows_aligned = pl.cdiv(rows_needed, row_align) * row_align
    block_rows = min(max_block_rows, rows_aligned)
    block_rows = pl.cdiv(block_rows, row_align) * row_align

    blocks_total = pl.cdiv(rows_aligned, block_rows)
    # Leading "parallel" axis: lets v7x shard blocks across its 2 TensorCores;
    # near-neutral on v5e/v6e (single core just iterates it).
    num_cores = 2 if blocks_total >= 2 else 1
    blocks_per_core = pl.cdiv(blocks_total, num_cores)
    padded_rows = num_cores * blocks_per_core * block_rows
    padded_total = padded_rows * LANE
    needs_mask = padded_total != total

    def _prep(x):
        flat = x.reshape(-1)
        if padded_total != total:
            flat = jnp.pad(flat, (0, padded_total - total))
        return flat.reshape(padded_rows, LANE)

    yt2 = _prep(y_true)
    yp2 = _prep(y_pred)

    kernel = partial(
        _logcosh_kernel,
        block_rows=block_rows,
        blocks_per_core=blocks_per_core,
        total_elems=total,
        needs_mask=needs_mask,
    )

    partials = pl.pallas_call(
        kernel,
        out_shape=jax.ShapeDtypeStruct((num_cores, LANE), jnp.float32),
        grid_spec=pltpu.PrefetchScalarGridSpec(
            num_scalar_prefetch=0,
            grid=(num_cores, blocks_per_core),
            in_specs=[
                pl.BlockSpec((block_rows, LANE),
                             lambda c, i: (c * blocks_per_core + i, 0)),
                pl.BlockSpec((block_rows, LANE),
                             lambda c, i: (c * blocks_per_core + i, 0)),
            ],
            out_specs=pl.BlockSpec((1, LANE), lambda c, i: (c, 0)),
            scratch_shapes=[pltpu.VMEM((SUBLANE, LANE), jnp.float32)],
        ),
        compiler_params=pltpu.CompilerParams(
            dimension_semantics=("parallel", "arbitrary"),
        ),
    )(yt2, yp2)

    # Tiny final cross-lane reduce + compile-time reciprocal (mul, not div).
    return (jnp.sum(partials) * jnp.float32(1.0 / total)).astype(jnp.float32)


if __name__ == "__main__":
    key = jax.random.PRNGKey(0)
    k1, k2 = jax.random.split(key)
    shape = (2, 4, 16, 16)  # NCHW-style input; elementwise loss is layout-agnostic
    y_true = jax.random.normal(k1, shape, dtype=jnp.float32)
    y_pred = jax.random.normal(k2, shape, dtype=jnp.float32)

    loss = logcosh_loss(y_true, y_pred)
    jax.block_until_ready(loss)

    # Sanity check against a pure-JAX reference.
    ref = jnp.mean(jnp.log(jnp.cosh(y_pred - y_true)))
    assert jnp.allclose(loss, ref, rtol=1e-5, atol=1e-5), (loss, ref)

    # Extra check: ragged size exercising the padding/mask path.
    n = 10_007
    a = jax.random.normal(k1, (n,), dtype=jnp.float32)
    b = jax.random.normal(k2, (n,), dtype=jnp.float32)
    loss2 = logcosh_loss(a, b)
    ref2 = jnp.mean(jnp.log(jnp.cosh(b - a)))
    assert jnp.allclose(loss2, ref2, rtol=1e-5, atol=1e-5), (loss2, ref2)

    print("KERNEL_OK")
</pallas_src>

<mosaic_0001>
module attributes {stable_mosaic.version = 11 : i64} {
  func.func @_logcosh_kernel(%arg0: i32, %arg1: i32, %arg2: memref<16x128xf32, #tpu.memory_space<vmem>>, %arg3: memref<16x128xf32, #tpu.memory_space<vmem>>, %arg4: memref<1x128xf32, #tpu.memory_space<vmem>>, %arg5: memref<8x128xf32, #tpu.memory_space<vmem>>) attributes {dimension_semantics = [#tpu.dimension_semantics<parallel>, #tpu.dimension_semantics<arbitrary>], iteration_bounds = array<i64: 1, 1>, scalar_prefetch = 0 : i64, scratch_operands = 1 : i64, tpu.core_type = #tpu.core_type<tc>, window_params = [{transform_indices = @transform_0, window_bounds = array<i64: 16, 128>}, {transform_indices = @transform_1, window_bounds = array<i64: 16, 128>}, {transform_indices = @transform_2, window_bounds = array<i64: 1, 128>}]} {
    %c0_i32 = arith.constant 0 : i32
    %0 = arith.cmpi eq, %arg1, %c0_i32 : i32
    %1 = arith.extui %0 : i1 to i32
    %c0_i32_0 = arith.constant 0 : i32
    %2 = arith.cmpi ne, %1, %c0_i32_0 : i32
    scf.if %2 {
      %cst_12 = arith.constant 0.000000e+00 : f32
      %22 = vector.broadcast %cst_12 : f32 to vector<8x128xf32>
      %c0_13 = arith.constant 0 : index
      %c0_14 = arith.constant 0 : index
      %23 = vector.load %arg5[%c0_13, %c0_14] : memref<8x128xf32, #tpu.memory_space<vmem>>, vector<8x128xf32>
      tpu.vector_store %arg5[%c0_13, %c0_14], %22 {strides = array<i32>} : memref<8x128xf32, #tpu.memory_space<vmem>>, vector<8x128xf32>,
    } else {
    }
    %c0 = arith.constant 0 : index
    %c0_1 = arith.constant 0 : index
    %3 = vector.load %arg3[%c0, %c0_1] : memref<16x128xf32, #tpu.memory_space<vmem>>, vector<16x128xf32>
    %c0_2 = arith.constant 0 : index
    %c0_3 = arith.constant 0 : index
    %4 = vector.load %arg2[%c0_2, %c0_3] : memref<16x128xf32, #tpu.memory_space<vmem>>, vector<16x128xf32>
    %5 = arith.subf %3, %4 : vector<16x128xf32>
    %6 = math.absf %5 : vector<16x128xf32>
    %cst = arith.constant -2.000000e+00 : f32
    %7 = vector.broadcast %cst : f32 to vector<16x128xf32>
    %8 = arith.mulf %7, %6 : vector<16x128xf32>
    %9 = math.exp %8 : vector<16x128xf32>
    %10 = math.log1p %9 : vector<16x128xf32>
    %11 = arith.addf %6, %10 : vector<16x128xf32>
    %cst_4 = arith.constant 0.693147182 : f32
    %12 = vector.broadcast %cst_4 : f32 to vector<16x128xf32>
    %13 = arith.subf %11, %12 : vector<16x128xf32>
    %c0_5 = arith.constant 0 : index
    %c0_6 = arith.constant 0 : index
    %14 = vector.load %arg5[%c0_5, %c0_6] : memref<8x128xf32, #tpu.memory_space<vmem>>, vector<8x128xf32>
    %15 = vector.shape_cast %13 : vector<16x128xf32> to vector<2x8x128xf32>
    %cst_7 = arith.constant dense<0.000000e+00> : vector<8x128xf32>
    %16 = vector.multi_reduction <add>, %15, %cst_7 [0] : vector<2x8x128xf32> to vector<8x128xf32>
    %17 = arith.addf %14, %16 : vector<8x128xf32>
    %c0_8 = arith.constant 0 : index
    %c0_9 = arith.constant 0 : index
    %18 = vector.load %arg5[%c0_8, %c0_9] : memref<8x128xf32, #tpu.memory_space<vmem>>, vector<8x128xf32>
    tpu.vector_store %arg5[%c0_8, %c0_9], %17 {strides = array<i32>} : memref<8x128xf32, #tpu.memory_space<vmem>>, vector<8x128xf32>,
    %c0_i32_10 = arith.constant 0 : i32
    %19 = arith.cmpi eq, %arg1, %c0_i32_10 : i32
    %20 = arith.extui %19 : i1 to i32
    %c0_i32_11 = arith.constant 0 : i32
    %21 = arith.cmpi ne, %20, %c0_i32_11 : i32
    scf.if %21 {
      %c0_12 = arith.constant 0 : index
      %c0_13 = arith.constant 0 : index
      %22 = vector.load %arg5[%c0_12, %c0_13] : memref<8x128xf32, #tpu.memory_space<vmem>>, vector<8x128xf32>
      %cst_14 = arith.constant dense<0.000000e+00> : vector<128xf32>
      %23 = vector.multi_reduction <add>, %22, %cst_14 [0] : vector<8x128xf32> to vector<128xf32>
      %24 = vector.shape_cast %23 : vector<128xf32> to vector<1x128xf32>
      %c0_15 = arith.constant 0 : index
      %c0_16 = arith.constant 0 : index
      %25 = vector.load %arg4[%c0_15, %c0_16] : memref<1x128xf32, #tpu.memory_space<vmem>>, vector<1x128xf32>
      tpu.vector_store %arg4[%c0_15, %c0_16], %24 {strides = array<i32>} : memref<1x128xf32, #tpu.memory_space<vmem>>, vector<1x128xf32>,
    } else {
    }
    return
  }
  func.func @transform_0(%arg0: i32, %arg1: i32) -> (i32, i32) {
    %c1_i32 = arith.constant 1 : i32
    %0 = arith.muli %arg0, %c1_i32 : i32
    %1 = arith.addi %0, %arg1 : i32
    %c0_i32 = arith.constant 0 : i32
    %c0_i32_0 = arith.constant 0 : i32
    return %1, %c0_i32 : i32, i32
  }
  func.func @transform_1(%arg0: i32, %arg1: i32) -> (i32, i32) {
    %c1_i32 = arith.constant 1 : i32
    %0 = arith.muli %arg0, %c1_i32 : i32
    %1 = arith.addi %0, %arg1 : i32
    %c0_i32 = arith.constant 0 : i32
    %c0_i32_0 = arith.constant 0 : i32
    return %1, %c0_i32 : i32, i32
  }
  func.func @transform_2(%arg0: i32, %arg1: i32) -> (i32, i32) {
    %c0_i32 = arith.constant 0 : i32
    %c0_i32_0 = arith.constant 0 : i32
    return %arg0, %c0_i32 : i32, i32
  }
}

</mosaic_0001>

<bundles_post_ra>
// kernel: tpu_custom_call.1
= control target key start
LH: loop header
LB: loop body
LE: loop exit
PB: predicated region body
PF: predicated region fallthrough
CT: control target
= control target key end

     0   :  { %7 = vsyncpa [#allocation4], 0  ;;  %s252_s0 = inlined_call_operand.hbm [shape: f32[16,128], index: 0, kind: input, shape index: {}]   ;;  %s253_s1 = inlined_call_operand.hbm [shape: f32[16,128], index: 1, kind: input, shape index: {}]   ;;  %s254_s2 = inlined_call_operand.hbm [shape: f32[1,128], index: 2, kind: output, shape index: {}]  }
   0x1   :  { %8 = vsyncpa [#allocation7], 0 }
   0x2   :  { %9 = vsyncpa [#allocation5], 0  ;;  %s18_s11 = sshll.u32 %s252_s0, 4  ;;  %s223_s12 = smov [#allocation3]   ;;  %s19_s11 = int_to_ptr.hbm [resolvable:$true] %s18_s11 }
   0x3   :  { %s20_s13 = sshll.u32 %s223_s12, 4  ;;  %s35_s16 = sshll.u32 %s253_s1, 4  ;;  %s21_s13 = int_to_ptr.vmem [resolvable:$true] %s20_s13  ;;  %s36_s16 = int_to_ptr.hbm [resolvable:$true] %s35_s16 }
   0x4   :  { %s224_s17 = smov 128   ;;  %s225_s18 = smov 8  }
   0x5   :  { %26 = dma.hbm_to_vmem [thread:$0]  %s19_s11, 256, %s21_s13, [#allocation4], %s224_s17, %s224_s17, %s225_s18  }
   0x6   :  { %s226_s19 = smov [#allocation6]  }
   0x7   :  { %s37_s20 = sshll.u32 %s226_s19, 4  ;;  %s38_s20 = int_to_ptr.vmem [resolvable:$true] %s37_s20 }
   0x8   :  { %43 = dma.hbm_to_vmem [thread:$0]  %s36_s16, 256, %s38_s20, [#allocation7], %s224_s17, %s224_s17, %s225_s18  }
   0x9   :  { %217 = dma.done.wait [#allocation4], 256  }
   0xa   :  { %218 = vsyncadd [#allocation4], 4294967040 }
   0xb   :  { %219 = dma.done.wait [#allocation7], 256  }
   0xc   :  { %220 = vsyncadd [#allocation7], 4294967040  ;;  %v61_v0 = vld [vmem:[#allocation6] sm:$0xff]  ;;  %v62_v1 = vld [vmem:[#allocation6 + $0x8] sm:$0xff]  ;;  %s227_s0 = smov [#allocation8]   ;;  %s119_s23 = sshll.u32 %s254_s2, 4  ;;  %s120_s23 = int_to_ptr.hbm [resolvable:$true] %s119_s23 }
   0xd   :  { %v63_v2 = vld [vmem:[#allocation3] sm:$0xff]  ;;  %v64_v3 = vld [vmem:[#allocation3 + $0x8] sm:$0xff]  ;;  %s117_s1 = sshll.u32 %s227_s0, 4  ;;  %s118_s1 = int_to_ptr.vmem [resolvable:$true] %s117_s1 }
   0xe   :  { %v65_v4 = vsub.f32 %v61_v0, %v63_v2  ;;  %v66_v5 = vsub.f32 %v62_v1, %v64_v3 }
  0x10   :  { %v67_v6 = vand.u32 2147483647, %v65_v4  ;;  %v68_v7 = vand.u32 2147483647, %v66_v5 }
  0x12   :  { %v69_v8 = vmul.f32 -2.0, %v67_v6  ;;  %v70_v9 = vmul.f32 -2.0, %v68_v7 }
  0x14   :  { %v71_v10 = vmul.f32 1.442695, %v69_v8  ;;  %v73_v11 = vmul.f32 1.442695, %v70_v9 }
  0x16   :  { %137 = vpow2.f32 %v71_v10 }
  0x17   :  { %139 = vpow2.f32 %v73_v11 }
  0x1c   :  { %v138_v12 = vpop.eup %137 }
  0x1d   :  { %v140_v13 = vpop.eup %139  ;;  %v75_v14 = vadd.f32 1.0, %v138_v12  ;;  %v78_v15 = vmul.f32 -0.5, %v138_v12  ;;  %v81_v19 = vand.u32 2147483647, %v138_v12 }
  0x1e   :  { %v84_v16 = vadd.f32 1.0, %v140_v13  ;;  %v87_v17 = vmul.f32 -0.5, %v140_v13  ;;  %v90_v21 = vand.u32 2147483647, %v140_v13 }
  0x1f   :  { %141 = vlog2.f32 %v75_v14  ;;  %v79_v18 = vadd.f32 1.0, %v78_v15  ;;  %vm82_vm0 = vcmp.lt.f32.partialorder %v81_v19, 0.0004427343 }
  0x20   :  { %143 = vlog2.f32 %v84_v16  ;;  %v88_v20 = vadd.f32 1.0, %v87_v17  ;;  %vm91_vm1 = vcmp.lt.f32.partialorder %v90_v21, 0.0004427343 }
  0x21   :  { %v80_v22 = vmul.f32 %v138_v12, %v79_v18 }
  0x22   :  { %v89_v24 = vmul.f32 %v140_v13, %v88_v20 }
  0x25   :  { %v142_v23 = vpop.eup %141 }
  0x26   :  { %v144_v25 = vpop.eup %143  ;;  %v77_v26 = vmul.f32 0.6931472, %v142_v23 }
  0x27   :  { %v86_v27 = vmul.f32 0.6931472, %v144_v25 }
  0x28   :  { %v83_v28 = vsel %vm82_vm0, %v80_v22, %v77_v26 }
  0x29   :  { %v92_v29 = vsel %vm91_vm1, %v89_v24, %v86_v27  ;;  %v93_v30 = vadd.f32 %v83_v28, %v67_v6 }
  0x2a   :  { %v94_v31 = vadd.f32 %v92_v29, %v68_v7 }
  0x2b   :  { %v130_v32 = vadd.f32 -0.6931472, %v93_v30 }
  0x2c   :  { %v131_v33 = vadd.f32 -0.6931472, %v94_v31 }
  0x2e   :  { %v98_v34 = vadd.f32 %v131_v33, %v130_v32 }
  0x30   :  { %v105_v35 = vrot.slane %v98_v34, 4 }
  0x32   :  { %v106_v36 = vadd.f32 %v105_v35, %v98_v34 }
  0x34   :  { %v107_v37 = vrot.slane %v106_v36, 2 }
  0x36   :  { %v108_v38 = vadd.f32 %v107_v37, %v106_v36 }
  0x38   :  { %v109_v39 = vrot.slane %v108_v38, 1 }
  0x3a   :  { %v110_v40 = vadd.f32 %v109_v39, %v108_v38 }
  0x3c   :  { %111 = vst [vmem:[#allocation8] sm:$0x1] %v110_v40 }
  0x3d   :  { %122 = dma.vmem_to_hbm [thread:$0]  %s118_s1, 16, %s120_s23, [#allocation5]  }
  0x3e   :  { %221 = dma.done.wait [#allocation5], 16  }
  0x3f   :  { %222 = vsyncadd [#allocation5], 4294967280 }
  0x40   :  { %127 = vsyncpa [#allocation4], 1 }
  0x41   :  { %128 = vsyncpa [#allocation7], 1 }
  0x42   :  { %129 = vsyncpa [#allocation5], 1 }

</bundles_post_ra>
